<compile_context>
chip_gen: v7x
topology: tpu7x:2x2x1
jax: 0.10.0
libtpu: 0.0.40
codegen_flags: <defaults>
</compile_context>

<pallas_src>
import functools

import jax
import jax.numpy as jnp
from jax import lax
from jax.experimental import pallas as pl
from jax.experimental.pallas import tpu as pltpu


def _round_up(x, m):
    return ((x + m - 1) // m) * m


def costnn_kernel(x_ref, w1_ref, b1_ref, w2p_ref, b2_ref, o_ref, *, compute_dtype):
    # Layer 1 on the MXU: (block_b, state_dim) @ (state_dim, hidden), f32 accumulation.
    xx = x_ref[...].astype(compute_dtype)
    ww = w1_ref[...].astype(compute_dtype)
    h = jnp.dot(xx, ww, preferred_element_type=jnp.float32)
    h = jnp.maximum(h + b1_ref[...], 0.0)  # bias + ReLU (VPU)

    # Layer 2 as an NT matmul: (of_pad, hidden) x (block_b, hidden)^T -> (of_pad, block_b).
    # Batch ends up on the lane axis => lane-dense output stores.
    y_t = lax.dot_general(
        w2p_ref[...], h,
        dimension_numbers=(((1,), (1,)), ((), ())),
        preferred_element_type=jnp.float32,
    )

    out_f = o_ref.shape[0]
    for j in range(out_f):  # static unroll; out_features is tiny (usually 1)
        o_ref[j:j + 1, :] = (y_t[j:j + 1, :] + b2_ref[j]).astype(o_ref.dtype)


@functools.partial(jax.jit, static_argnames=("block_b", "compute_dtype"))
def costnn_forward(x, w1, b1, w2, b2, *, block_b=512, compute_dtype=jnp.float32):
    """relu(x @ w1 + b1) @ w2 + b2  (CostNN forward)."""
    B, state_dim = x.shape
    hidden = w1.shape[1]
    out_features = w2.shape[1]

    # Batch tiling: big tiles amortize the ~0.35us/step grid overhead and feed the
    # 128/256-row MXU; small batches become a single grid step.
    block_b_eff = _round_up(min(block_b, _round_up(B, 128)), 128)
    B_pad = _round_up(B, block_b_eff)
    n_blocks = B_pad // block_b_eff

    x_pad = jnp.pad(x, ((0, B_pad - B), (0, 0)))

    # Pad out_features up to a full sublane group so the NT matmul has M >= 8.
    of_pad = _round_up(out_features, 8)
    w2p = jnp.zeros((of_pad, hidden), dtype=w1.dtype).at[:out_features, :].set(w2.T)
    b2_flat = b2.reshape(out_features).astype(jnp.float32)

    kernel = functools.partial(costnn_kernel, compute_dtype=compute_dtype)

    itemsize = x.dtype.itemsize
    cost = pl.CostEstimate(
        flops=2 * B_pad * state_dim * hidden + 2 * B_pad * hidden * out_features,
        transcendentals=0,
        bytes_accessed=(B_pad * state_dim * itemsize
                        + w1.size * w1.dtype.itemsize
                        + w2p.size * w2p.dtype.itemsize
                        + b1.size * b1.dtype.itemsize
                        + out_features * B_pad * itemsize),
    )

    # TODO(synk): x vregs are 32/128-lane dense when state_dim=32; packing the
    # feature dim would cut vld pressure but costs extra HBM traffic, so skipped.
    out_t = pl.pallas_call(
        kernel,
        out_shape=jax.ShapeDtypeStruct((out_features, B_pad), x.dtype),
        grid=(n_blocks,),
        in_specs=[
            pl.BlockSpec((block_b_eff, state_dim), lambda i: (i, 0)),   # x tile
            pl.BlockSpec((state_dim, hidden), lambda i: (0, 0)),        # W1 (resident)
            pl.BlockSpec((1, hidden), lambda i: (0, 0)),                # b1 (resident)
            pl.BlockSpec((of_pad, hidden), lambda i: (0, 0)),           # W2^T padded (resident)
            pl.BlockSpec(memory_space=pltpu.MemorySpace.SMEM),          # b2 scalar(s)
        ],
        out_specs=pl.BlockSpec((out_features, block_b_eff), lambda i: (0, i)),
        compiler_params=pltpu.CompilerParams(
            dimension_semantics=("parallel",),
        ),
        cost_estimate=cost,
    )(x_pad, w1, b1, w2p, b2_flat)

    # (out_features, B_pad) -> (B, out_features); for out_features=1 this is a reshape.
    return out_t[:, :B].T


def init_params(key, state_dim, hidden_dim1=128, out_features=1, dtype=jnp.float32):
    """Deterministic init mimicking torch.nn.Linear default U(-1/sqrt(fan_in), +)."""
    k1, k2, k3, k4 = jax.random.split(key, 4)
    bound1 = 1.0 / float(state_dim) ** 0.5
    bound2 = 1.0 / float(hidden_dim1) ** 0.5
    w1 = jax.random.uniform(k1, (state_dim, hidden_dim1), dtype, -bound1, bound1)
    b1 = jax.random.uniform(k2, (1, hidden_dim1), dtype, -bound1, bound1)
    w2 = jax.random.uniform(k3, (hidden_dim1, out_features), dtype, -bound2, bound2)
    b2 = jax.random.uniform(k4, (out_features,), dtype, -bound2, bound2)
    return w1, b1, w2, b2


def costnn_ref(x, w1, b1, w2, b2):
    h = jnp.maximum(x @ w1 + b1, 0.0)
    return h @ w2 + b2


if __name__ == "__main__":
    key = jax.random.PRNGKey(0)
    k_x, k_p = jax.random.split(key)

    state_dim, hidden_dim1, out_features = 32, 128, 1
    w1, b1, w2, b2 = init_params(k_p, state_dim, hidden_dim1, out_features)

    # Small batch (single grid step), non-divisible batch (padding path),
    # and a multi-block batch (exercises the parallel grid / lane-dense out map).
    for B, blk in ((16, 512), (300, 512), (1024, 256)):
        x = jax.random.normal(jax.random.fold_in(k_x, B), (B, state_dim),
                              dtype=jnp.float32)
        out = costnn_forward(x, w1, b1, w2, b2, block_b=blk)
        out = jax.block_until_ready(out)
        ref = costnn_ref(x, w1, b1, w2, b2)
        assert out.shape == (B, out_features), out.shape
        assert jnp.allclose(out, ref, atol=1e-4, rtol=1e-5), f"mismatch at B={B}"

    print("KERNEL_OK")
</pallas_src>

<mosaic_0001>
module attributes {stable_mosaic.version = 11 : i64} {
  func.func @costnn_kernel(%arg0: i32, %arg1: memref<128x32xf32, #tpu.memory_space<vmem>>, %arg2: memref<32x128xf32, #tpu.memory_space<vmem>>, %arg3: memref<1x128xf32, #tpu.memory_space<vmem>>, %arg4: memref<8x128xf32, #tpu.memory_space<vmem>>, %arg5: memref<1xf32, #tpu.memory_space<smem>>, %arg6: memref<1x128xf32, #tpu.memory_space<vmem>>) attributes {dimension_semantics = [#tpu.dimension_semantics<parallel>], iteration_bounds = array<i64: 1>, scalar_prefetch = 0 : i64, scratch_operands = 0 : i64, tpu.core_type = #tpu.core_type<tc>, window_params = [{transform_indices = @transform_0, window_bounds = array<i64: 128, 32>}, {pipeline_mode = #tpu.pipeline_mode<synchronous>, transform_indices = @transform_1, window_bounds = array<i64: 32, 128>}, {pipeline_mode = #tpu.pipeline_mode<synchronous>, transform_indices = @transform_2, window_bounds = array<i64: 1, 128>}, {pipeline_mode = #tpu.pipeline_mode<synchronous>, transform_indices = @transform_3, window_bounds = array<i64: 8, 128>}, {transform_indices = @transform_4, window_bounds = array<i64: 1>}, {transform_indices = @transform_5, window_bounds = array<i64: 1, 128>}]} {
    %c0 = arith.constant 0 : index
    %c0_0 = arith.constant 0 : index
    %0 = vector.load %arg1[%c0, %c0_0] : memref<128x32xf32, #tpu.memory_space<vmem>>, vector<128x32xf32>
    %c0_1 = arith.constant 0 : index
    %c0_2 = arith.constant 0 : index
    %1 = vector.load %arg2[%c0_1, %c0_2] : memref<32x128xf32, #tpu.memory_space<vmem>>, vector<32x128xf32>
    %cst = arith.constant dense<0.000000e+00> : vector<128x128xf32>
    %2 = tpu.matmul %0, %1, %cst {dimension_numbers = #tpu.dot_dimension_numbers<[1], [0], [0], [1], [0, 0, 1, 1], [], []>} : vector<128x32xf32>, vector<32x128xf32>, vector<128x128xf32> -> vector<128x128xf32>
    %c0_3 = arith.constant 0 : index
    %c0_4 = arith.constant 0 : index
    %3 = vector.load %arg3[%c0_3, %c0_4] : memref<1x128xf32, #tpu.memory_space<vmem>>, vector<1x128xf32>
    %4 = vector.broadcast %3 : vector<1x128xf32> to vector<128x128xf32>
    %5 = arith.addf %2, %4 : vector<128x128xf32>
    %cst_5 = arith.constant 0.000000e+00 : f32
    %6 = vector.broadcast %cst_5 : f32 to vector<128x128xf32>
    %7 = arith.maximumf %5, %6 : vector<128x128xf32>
    %c0_6 = arith.constant 0 : index
    %c0_7 = arith.constant 0 : index
    %8 = vector.load %arg4[%c0_6, %c0_7] : memref<8x128xf32, #tpu.memory_space<vmem>>, vector<8x128xf32>
    %cst_8 = arith.constant dense<0.000000e+00> : vector<8x128xf32>
    %9 = tpu.matmul %8, %7, %cst_8 {dimension_numbers = #tpu.dot_dimension_numbers<[1], [1], [0], [0], [0, 0, 1, 0], [], []>} : vector<8x128xf32>, vector<128x128xf32>, vector<8x128xf32> -> vector<8x128xf32>
    %10 = vector.extract_strided_slice %9 {offsets = [0, 0], sizes = [1, 128], strides = [1, 1]} : vector<8x128xf32> to vector<1x128xf32>
    %c0_9 = arith.constant 0 : index
    %11 = memref.load %arg5[%c0_9] : memref<1xf32, #tpu.memory_space<smem>>
    %12 = vector.broadcast %11 : f32 to vector<1x128xf32>
    %13 = arith.addf %10, %12 : vector<1x128xf32>
    %c0_10 = arith.constant 0 : index
    %c0_11 = arith.constant 0 : index
    %14 = vector.load %arg6[%c0_10, %c0_11] : memref<1x128xf32, #tpu.memory_space<vmem>>, vector<1x128xf32>
    tpu.vector_store %arg6[%c0_10, %c0_11], %13 {strides = array<i32>} : memref<1x128xf32, #tpu.memory_space<vmem>>, vector<1x128xf32>,
    return
  }
  func.func @transform_0(%arg0: i32) -> (i32, i32) {
    %c0_i32 = arith.constant 0 : i32
    %c0_i32_0 = arith.constant 0 : i32
    return %arg0, %c0_i32 : i32, i32
  }
  func.func @transform_1(%arg0: i32) -> (i32, i32) {
    %c0_i32 = arith.constant 0 : i32
    %c0_i32_0 = arith.constant 0 : i32
    %c0_i32_1 = arith.constant 0 : i32
    return %c0_i32, %c0_i32_0 : i32, i32
  }
  func.func @transform_2(%arg0: i32) -> (i32, i32) {
    %c0_i32 = arith.constant 0 : i32
    %c0_i32_0 = arith.constant 0 : i32
    %c0_i32_1 = arith.constant 0 : i32
    return %c0_i32, %c0_i32_0 : i32, i32
  }
  func.func @transform_3(%arg0: i32) -> (i32, i32) {
    %c0_i32 = arith.constant 0 : i32
    %c0_i32_0 = arith.constant 0 : i32
    %c0_i32_1 = arith.constant 0 : i32
    return %c0_i32, %c0_i32_0 : i32, i32
  }
  func.func @transform_4(%arg0: i32) -> i32 {
    %c0_i32 = arith.constant 0 : i32
    %c0_i32_0 = arith.constant 0 : i32
    return %c0_i32 : i32
  }
  func.func @transform_5(%arg0: i32) -> (i32, i32) {
    %c0_i32 = arith.constant 0 : i32
    %c0_i32_0 = arith.constant 0 : i32
    return %c0_i32, %arg0 : i32, i32
  }
}

</mosaic_0001>

<bundles_post_ra>
// kernel: costnn_forward.1
= control target key start
LH: loop header
LB: loop body
LE: loop exit
PB: predicated region body
PF: predicated region fallthrough
CT: control target
= control target key end

     0   :  { %vm48_vm0 = vcmask 261120   ;;  %v493_v22 = vmov 0.0|0.0   ;;  %vm494_vm1 = vmmov 0   ;;  %v495_v23 = vmov 0.0   ;;  %s622_s1 = inlined_call_operand.vmem [shape: f32[32,128], index: 1, kind: input, shape index: {}]   ;;  %s623_s0 = inlined_call_operand.vmem [shape: f32[128,32], index: 0, kind: input, shape index: {}]   ;;  %s624_s2 = inlined_call_operand.vmem [shape: f32[1,128], index: 2, kind: input, shape index: {}]   ;;  %s625_s3 = inlined_call_operand.vmem [shape: f32[8,128], index: 3, kind: input, shape index: {}]   ;;  %s626_s4 = inlined_call_operand.<no memory space> [shape: f32[1], index: 4, kind: input, shape index: {}]   ;;  %s627_s5 = inlined_call_operand.vmem [shape: f32[1,128], index: 5, kind: output, shape index: {}]  }
   0x1   :  { %v37_v0 = vld [vmem:[%s622_s1] sm:$0xff]  ;;  %v38_v1 = vld [vmem:[%s622_s1 + $0x8] sm:$0xff]  ;;  %v39_v2 = vld [vmem:[%s622_s1 + $0x10] sm:$0xff]  ;;  %466 = vmatprep.subr.bf16.mxu1 %v493_v22  ;;  %455 = vmatprep.mubr.msk.f32.mxu1 %vm494_vm1, %v495_v23 }
   0x2   :  { %v458_v3 = vpack.c.bf16 %v38_v1, %v37_v0  ;;  %v40_v4 = vld [vmem:[%s622_s1 + $0x18] sm:$0xff]  ;;  %v21_v5 = vld [vmem:[%s623_s0] sm:$0xff]  ;;  %v22_v7 = vld [vmem:[%s623_s0 + $0x8] sm:$0xff] }
   0x3   :  { %v462_v6 = vpack.c.bf16 %v40_v4, %v39_v2  ;;  %399 = vmatprep.mubr.msk.f32.mxu0 %vm48_vm0, %v21_v5  ;;  %v23_v8 = vld [vmem:[%s623_s0 + $0x10] sm:$0xff]  ;;  %v24_v9 = vld [vmem:[%s623_s0 + $0x18] sm:$0xff]  ;;  %v25_v10 = vld [vmem:[%s623_s0 + $0x20] sm:$0xff] }
   0x4   :  { %459 = vmatprep.subr.bf16.mxu0 %v458_v3  ;;  %v26_v11 = vld [vmem:[%s623_s0 + $0x28] sm:$0xff]  ;;  %v27_v12 = vld [vmem:[%s623_s0 + $0x30] sm:$0xff]  ;;  %v28_v13 = vld [vmem:[%s623_s0 + $0x38] sm:$0xff] }
   0x5   :  { %461 = vmatpush3.bf16.msra.mxu0 %v458_v3  ;;  %v29_v14 = vld [vmem:[%s623_s0 + $0x40] sm:$0xff]  ;;  %v30_v15 = vld [vmem:[%s623_s0 + $0x48] sm:$0xff]  ;;  %v31_v16 = vld [vmem:[%s623_s0 + $0x50] sm:$0xff] }
   0x6   :  { %463 = vmatprep.subr.bf16.mxu0 %v462_v6  ;;  %v32_v17 = vld [vmem:[%s623_s0 + $0x58] sm:$0xff]  ;;  %v33_v18 = vld [vmem:[%s623_s0 + $0x60] sm:$0xff]  ;;  %v34_v19 = vld [vmem:[%s623_s0 + $0x68] sm:$0xff] }
   0x7   :  { %v35_v20 = vld [vmem:[%s623_s0 + $0x70] sm:$0xff]  ;;  %v36_v21 = vld [vmem:[%s623_s0 + $0x78] sm:$0xff]  ;;  %v337_v24 = vld [vmem:[%s624_s2] ss:$0 sm:$0xff] }
   0x9   :  { %465 = vmatpush3.bf16.msra.mxu0 %v462_v6 }
   0xc   :  { %400 = vmatmul.mubr.msk.f32.vlgmr.msra.gmra.mrb[0].mxu0 %vm48_vm0, %v22_v7 }
   0xd   :  { %402 = vmatprep.mubr.msk.f32.mxu0 %vm48_vm0, %v23_v8 }
  0x10   :  { %403 = vmatmul.mubr.msk.f32.gmra.mrb[2].mxu0 %vm48_vm0, %v24_v9 }
  0x11   :  { %405 = vmatprep.mubr.msk.f32.mxu0 %vm48_vm0, %v25_v10 }
  0x14   :  { %406 = vmatmul.mubr.msk.f32.gmra.mrb[4].mxu0 %vm48_vm0, %v26_v11 }
  0x15   :  { %408 = vmatprep.mubr.msk.f32.mxu0 %vm48_vm0, %v27_v12 }
  0x18   :  { %409 = vmatmul.mubr.msk.f32.gmra.mrb[6].mxu0 %vm48_vm0, %v28_v13 }
  0x19   :  { %411 = vmatprep.mubr.msk.f32.mxu0 %vm48_vm0, %v29_v14 }
  0x1c   :  { %412 = vmatmul.mubr.msk.f32.gmra.mrb[8].mxu0 %vm48_vm0, %v30_v15 }
  0x1d   :  { %414 = vmatprep.mubr.msk.f32.mxu0 %vm48_vm0, %v31_v16 }
  0x20   :  { %415 = vmatmul.mubr.msk.f32.gmra.mrb[10].mxu0 %vm48_vm0, %v32_v17  ;;  %v258_v17 = vld [vmem:[%s625_s3] sm:$0xff] }
  0x21   :  { %417 = vmatprep.mubr.msk.f32.mxu0 %vm48_vm0, %v33_v18  ;;  %v330_v18 = vstv %s626_s4 }
  0x24   :  { %418 = vmatmul.mubr.msk.f32.gmra.mrb[12].mxu0 %vm48_vm0, %v34_v19 }
  0x25   :  { %420 = vmatprep.mubr.msk.f32.mxu0 %vm48_vm0, %v35_v20 }
  0x28   :  { %421 = vmatmul.mubr.msk.f32.gmra.mrb[14].mxu0 %vm48_vm0, %v36_v21 }
  0xdf   :  { %v401_v25 = vpop.f32.mrb[0].mxu0 }
  0xe0   :  { %v169_v26 = vadd.f32 %v401_v25, %v337_v24  ;;  %v163_v27 = vpop.f32.mrb[1].mxu0 }
  0xe1   :  { %v164_v28 = vadd.f32 %v337_v24, %v163_v27 }
  0xe2   :  { %v243_v29 = vmax.f32 %v169_v26, 0.0 }
  0xe3   :  { %v242_v30 = vmax.f32 %v164_v28, 0.0  ;;  %v404_v31 = vpop.f32.mrb[2].mxu0 }
  0xe4   :  { %v179_v32 = vadd.f32 %v404_v31, %v337_v24  ;;  %v173_v33 = vpop.f32.mrb[3].mxu0 }
  0xe5   :  { %v174_v34 = vadd.f32 %v337_v24, %v173_v33  ;;  %v467_v35 = vpack.c.bf16 %v243_v29, %v242_v30 }
  0xe6   :  { %v245_v36 = vmax.f32 %v179_v32, 0.0 }
  0xe7   :  { %v244_v37 = vmax.f32 %v174_v34, 0.0  ;;  %468 = vmatpush3.bf16.xpose.msra.mxu1 %v467_v35  ;;  %v407_v38 = vpop.f32.mrb[4].mxu0 }
  0xe8   :  { %v189_v39 = vadd.f32 %v407_v38, %v337_v24  ;;  %469 = vmatprep.subr.bf16.mxu1 %v493_v22  ;;  %v183_v40 = vpop.f32.mrb[5].mxu0 }
  0xe9   :  { %v470_v41 = vpack.c.bf16 %v245_v36, %v244_v37  ;;  %v184_v42 = vadd.f32 %v337_v24, %v183_v40 }
  0xea   :  { %v247_v43 = vmax.f32 %v189_v39, 0.0 }
  0xeb   :  { %v246_v44 = vmax.f32 %v184_v42, 0.0  ;;  %v410_v45 = vpop.f32.mrb[6].mxu0 }
  0xec   :  { %v199_v46 = vadd.f32 %v410_v45, %v337_v24  ;;  %v193_v47 = vpop.f32.mrb[7].mxu0 }
  0xed   :  { %v473_v48 = vpack.c.bf16 %v247_v43, %v246_v44  ;;  %v194_v49 = vadd.f32 %v337_v24, %v193_v47 }
  0xee   :  { %v249_v50 = vmax.f32 %v199_v46, 0.0 }
  0xef   :  { %471 = vmatpush3.bf16.xpose.msra.mxu1 %v470_v41  ;;  %v248_v51 = vmax.f32 %v194_v49, 0.0  ;;  %v413_v52 = vpop.f32.mrb[8].mxu0 }
  0xf0   :  { %472 = vmatprep.subr.bf16.mxu1 %v493_v22  ;;  %v209_v53 = vadd.f32 %v413_v52, %v337_v24  ;;  %v203_v54 = vpop.f32.mrb[9].mxu0 }
  0xf1   :  { %v476_v55 = vpack.c.bf16 %v249_v50, %v248_v51  ;;  %v204_v56 = vadd.f32 %v337_v24, %v203_v54 }
  0xf2   :  { %v251_v57 = vmax.f32 %v209_v53, 0.0 }
  0xf3   :  { %v250_v58 = vmax.f32 %v204_v56, 0.0  ;;  %v416_v59 = vpop.f32.mrb[10].mxu0 }
  0xf4   :  { %v219_v60 = vadd.f32 %v416_v59, %v337_v24  ;;  %v213_v61 = vpop.f32.mrb[11].mxu0 }
  0xf5   :  { %v479_v62 = vpack.c.bf16 %v251_v57, %v250_v58  ;;  %v214_v63 = vadd.f32 %v337_v24, %v213_v61 }
  0xf6   :  { %v253_v0 = vmax.f32 %v219_v60, 0.0 }
  0xf7   :  { %474 = vmatpush3.bf16.xpose.msra.mxu1 %v473_v48  ;;  %v252_v1 = vmax.f32 %v214_v63, 0.0  ;;  %v419_v2 = vpop.f32.mrb[12].mxu0 }
  0xf8   :  { %475 = vmatprep.subr.bf16.mxu1 %v493_v22  ;;  %v229_v3 = vadd.f32 %v419_v2, %v337_v24  ;;  %v223_v4 = vpop.f32.mrb[13].mxu0 }
  0xf9   :  { %v482_v5 = vpack.c.bf16 %v253_v0, %v252_v1  ;;  %v224_v6 = vadd.f32 %v337_v24, %v223_v4 }
  0xfa   :  { %v255_v7 = vmax.f32 %v229_v3, 0.0 }
  0xfb   :  { %v254_v8 = vmax.f32 %v224_v6, 0.0  ;;  %v422_v9 = vpop.f32.mrb[14].mxu0 }
  0xfc   :  { %v239_v10 = vadd.f32 %v422_v9, %v337_v24  ;;  %v233_v11 = vpop.f32.mrb[15].mxu0 }
  0xfd   :  { %v485_v12 = vpack.c.bf16 %v255_v7, %v254_v8  ;;  %v234_v13 = vadd.f32 %v337_v24, %v233_v11 }
  0xfe   :  { %v257_v14 = vmax.f32 %v239_v10, 0.0 }
  0xff   :  { %477 = vmatpush3.bf16.xpose.msra.mxu1 %v476_v55  ;;  %v256_v15 = vmax.f32 %v234_v13, 0.0 }
 0x100   :  { %478 = vmatprep.subr.bf16.mxu1 %v493_v22 }
 0x101   :  { %v488_v16 = vpack.c.bf16 %v257_v14, %v256_v15 }
 0x107   :  { %480 = vmatpush3.bf16.xpose.msra.mxu1 %v479_v62 }
 0x108   :  { %481 = vmatprep.subr.bf16.mxu1 %v493_v22 }
 0x10f   :  { %483 = vmatpush3.bf16.xpose.msra.mxu1 %v482_v5 }
 0x110   :  { %484 = vmatprep.subr.bf16.mxu1 %v493_v22 }
 0x117   :  { %486 = vmatpush3.bf16.xpose.msra.mxu1 %v485_v12 }
 0x118   :  { %487 = vmatprep.subr.bf16.mxu1 %v493_v22 }
 0x11f   :  { %489 = vmatpush3.bf16.xpose.msra.mxu1 %v488_v16 }
 0x126   :  { %456 = vmatmul.mubr.f32.vlgmr.msra.gmra.mrb[0].mxu1 %v258_v17 }
 0x1f9   :  { %v325_v19 = vpop.f32.mrb[0].mxu1 }
 0x1fa   :  { %v331_v20 = vadd.f32 %v330_v18, %v325_v19  ;;  %v457_v21 = vpop.f32.mrb[1].mxu1 }
 0x1fc   :  { %332 = vst [vmem:[%s627_s5] sm:$0x1] %v331_v20 }

</bundles_post_ra>
